<compile_context>
chip_gen: v7x
topology: tpu7x:2x2x1
jax: 0.10.0
libtpu: 0.0.40
codegen_flags: <defaults>
</compile_context>

<pallas_src>
import jax
import jax.numpy as jnp
from jax.experimental import pallas as pl
from jax.experimental.pallas import tpu as pltpu

IN_FEATURES = 5
OUT_FEATURES = 10
W_QMIN, W_QMAX = 0.0, 15.0     # uint4 range (per-channel weight fake-quant)
A_QMIN, A_QMAX = 0.0, 255.0    # uint8 range (per-tensor activation fake-quant)


def _fq(x, scale, inv_scale, zp, qmin, qmax):
    q = jnp.clip(jnp.round(x * inv_scale) + zp, qmin, qmax)
    return (q - zp) * scale


def _kernel(a_params_ref, x_ref, w_t_ref, w_params_ref, o_ref):
    # per-tensor activation params: [scale, 1/scale, zero_point] in SMEM
    a_scale = a_params_ref[0]
    a_inv = a_params_ref[1]
    a_zp = a_params_ref[2]

    # fake-quantize the input per-tensor (uint8 range)
    xq = _fq(x_ref[...], a_scale, a_inv, a_zp, A_QMIN, A_QMAX)

    # per-channel weight params packed as rows of a (3, OUT) VMEM tile;
    # channel axis is on lanes, so the (1, OUT) rows broadcast cheaply over IN.
    ws = w_params_ref[0:1, :]     # scale      (1, OUT)
    w_inv = w_params_ref[1:2, :]  # 1/scale    (1, OUT)
    wzp = w_params_ref[2:3, :]    # zero point (1, OUT)

    # fake-quantize the (pre-transposed) weight per output channel (uint4 range)
    wq = _fq(w_t_ref[...], ws, w_inv, wzp, W_QMIN, W_QMAX)

    # linear without bias: (B, IN) @ (IN, OUT) -> (B, OUT); no in-kernel transpose
    y = jnp.dot(xq, wq, preferred_element_type=jnp.float32)

    # fake-quantize the output per-tensor (uint8 range)
    o_ref[...] = _fq(y, a_scale, a_inv, a_zp, A_QMIN, A_QMAX)


def fake_quant_linear(x, w, w_scale, w_zp, a_scale, a_zp):
    """x: (B, 5) f32; w: (10, 5) f32 (PyTorch Linear layout);
    w_scale/w_zp: (10,) f32; a_scale/a_zp: f32 scalars. Returns (B, 10) f32."""
    B = x.shape[0]

    # Wrapper-side layout plumbing (fused by XLA, off the kernel's critical path):
    w_t = w.T                                                   # (IN, OUT)
    w_params = jnp.stack([w_scale, 1.0 / w_scale, w_zp], 0)     # (3, OUT)
    a_params = jnp.stack([a_scale, 1.0 / a_scale, a_zp])        # (3,)

    # Gridless call: whole arrays as single VMEM tiles (full-array blocks are
    # exempt from the (8,128) divisibility rule); scalars live in SMEM.
    return pl.pallas_call(
        _kernel,
        out_shape=jax.ShapeDtypeStruct((B, OUT_FEATURES), jnp.float32),
        in_specs=[
            pl.BlockSpec(memory_space=pltpu.MemorySpace.SMEM),   # a_params (3,)
            pl.BlockSpec(memory_space=pltpu.MemorySpace.VMEM),   # x        (B, IN)
            pl.BlockSpec(memory_space=pltpu.MemorySpace.VMEM),   # w_t      (IN, OUT)
            pl.BlockSpec(memory_space=pltpu.MemorySpace.VMEM),   # w_params (3, OUT)
        ],
        out_specs=pl.BlockSpec(memory_space=pltpu.MemorySpace.VMEM),
    )(a_params, x, w_t, w_params)


def _reference(x, w, w_scale, w_zp, a_scale, a_zp):
    a_inv = 1.0 / a_scale
    xq = _fq(x, a_scale, a_inv, a_zp, A_QMIN, A_QMAX)
    wq = _fq(w, w_scale[:, None], 1.0 / w_scale[:, None], w_zp[:, None],
             W_QMIN, W_QMAX)
    y = xq @ wq.T
    return _fq(y, a_scale, a_inv, a_zp, A_QMIN, A_QMAX)


if __name__ == "__main__":
    key = jax.random.PRNGKey(0)
    kx, kw = jax.random.split(key)

    B = 2  # module example input is (1, 5); same math for any small batch
    x = jax.random.normal(kx, (B, IN_FEATURES), dtype=jnp.float32)

    # Deterministic Linear weight init (uniform with bound 1/sqrt(fan_in)).
    bound = 1.0 / (IN_FEATURES ** 0.5)
    w = jax.random.uniform(kw, (OUT_FEATURES, IN_FEATURES),
                           minval=-bound, maxval=bound, dtype=jnp.float32)
    # NOTE: the module's Linear bias is never used (F.linear called without bias).

    w_scale = jnp.ones((OUT_FEATURES,), jnp.float32)     # self.w_scale = [1.0]*10
    w_zp = jnp.zeros((OUT_FEATURES,), jnp.float32)       # self.w_zp = zeros(10)
    a_scale = jnp.float32(0.1)                            # per-tensor scale 0.1
    a_zp = jnp.float32(0.0)                               # per-tensor zero point 0

    out = jax.jit(fake_quant_linear)(x, w, w_scale, w_zp, a_scale, a_zp)
    out = jax.block_until_ready(out)

    ref = _reference(x, w, w_scale, w_zp, a_scale, a_zp)
    assert out.shape == (B, OUT_FEATURES)
    assert jnp.allclose(out, ref, atol=1e-5, rtol=1e-5), "mismatch vs reference"

    print("KERNEL_OK")
</pallas_src>

<mosaic_0001>
module attributes {stable_mosaic.version = 11 : i64} {
  func.func @_kernel(%arg0: memref<3xf32, #tpu.memory_space<smem>>, %arg1: memref<2x5xf32, #tpu.memory_space<vmem>>, %arg2: memref<5x10xf32, #tpu.memory_space<vmem>>, %arg3: memref<3x10xf32, #tpu.memory_space<vmem>>, %arg4: memref<2x10xf32, #tpu.memory_space<vmem>>) attributes {dimension_semantics = [], scalar_prefetch = 0 : i64, scratch_operands = 0 : i64, tpu.core_type = #tpu.core_type<tc>} {
    %c0 = arith.constant 0 : index
    %0 = memref.load %arg0[%c0] : memref<3xf32, #tpu.memory_space<smem>>
    %c1 = arith.constant 1 : index
    %1 = memref.load %arg0[%c1] : memref<3xf32, #tpu.memory_space<smem>>
    %c2 = arith.constant 2 : index
    %2 = memref.load %arg0[%c2] : memref<3xf32, #tpu.memory_space<smem>>
    %c0_0 = arith.constant 0 : index
    %c0_1 = arith.constant 0 : index
    %3 = vector.load %arg1[%c0_0, %c0_1] : memref<2x5xf32, #tpu.memory_space<vmem>>, vector<2x5xf32>
    %4 = vector.broadcast %1 : f32 to vector<2x5xf32>
    %5 = arith.mulf %3, %4 : vector<2x5xf32>
    %6 = math.roundeven %5 : vector<2x5xf32>
    %7 = vector.broadcast %2 : f32 to vector<2x5xf32>
    %8 = arith.addf %6, %7 : vector<2x5xf32>
    %cst = arith.constant 0.000000e+00 : f32
    %cst_2 = arith.constant 2.550000e+02 : f32
    %9 = vector.broadcast %cst : f32 to vector<2x5xf32>
    %10 = arith.maximumf %9, %8 : vector<2x5xf32>
    %11 = vector.broadcast %cst_2 : f32 to vector<2x5xf32>
    %12 = arith.minimumf %11, %10 : vector<2x5xf32>
    %13 = vector.broadcast %2 : f32 to vector<2x5xf32>
    %14 = arith.subf %12, %13 : vector<2x5xf32>
    %15 = vector.broadcast %0 : f32 to vector<2x5xf32>
    %16 = arith.mulf %14, %15 : vector<2x5xf32>
    %c0_3 = arith.constant 0 : index
    %c0_4 = arith.constant 0 : index
    %17 = vector.load %arg3[%c0_3, %c0_4] : memref<3x10xf32, #tpu.memory_space<vmem>>, vector<1x10xf32>
    %c1_5 = arith.constant 1 : index
    %c0_6 = arith.constant 0 : index
    %18 = vector.load %arg3[%c1_5, %c0_6] : memref<3x10xf32, #tpu.memory_space<vmem>>, vector<1x10xf32>
    %c2_7 = arith.constant 2 : index
    %c0_8 = arith.constant 0 : index
    %19 = vector.load %arg3[%c2_7, %c0_8] : memref<3x10xf32, #tpu.memory_space<vmem>>, vector<1x10xf32>
    %c0_9 = arith.constant 0 : index
    %c0_10 = arith.constant 0 : index
    %20 = vector.load %arg2[%c0_9, %c0_10] : memref<5x10xf32, #tpu.memory_space<vmem>>, vector<5x10xf32>
    %21 = vector.broadcast %18 : vector<1x10xf32> to vector<5x10xf32>
    %22 = arith.mulf %20, %21 : vector<5x10xf32>
    %23 = math.roundeven %22 : vector<5x10xf32>
    %24 = vector.broadcast %19 : vector<1x10xf32> to vector<5x10xf32>
    %25 = arith.addf %23, %24 : vector<5x10xf32>
    %cst_11 = arith.constant 0.000000e+00 : f32
    %cst_12 = arith.constant 1.500000e+01 : f32
    %26 = vector.broadcast %cst_11 : f32 to vector<5x10xf32>
    %27 = arith.maximumf %26, %25 : vector<5x10xf32>
    %28 = vector.broadcast %cst_12 : f32 to vector<5x10xf32>
    %29 = arith.minimumf %28, %27 : vector<5x10xf32>
    %30 = vector.broadcast %19 : vector<1x10xf32> to vector<5x10xf32>
    %31 = arith.subf %29, %30 : vector<5x10xf32>
    %32 = vector.broadcast %17 : vector<1x10xf32> to vector<5x10xf32>
    %33 = arith.mulf %31, %32 : vector<5x10xf32>
    %cst_13 = arith.constant dense<0.000000e+00> : vector<2x10xf32>
    %34 = tpu.matmul %16, %33, %cst_13 {dimension_numbers = #tpu.dot_dimension_numbers<[1], [0], [0], [1], [0, 0, 1, 1], [], []>} : vector<2x5xf32>, vector<5x10xf32>, vector<2x10xf32> -> vector<2x10xf32>
    %35 = vector.broadcast %1 : f32 to vector<2x10xf32>
    %36 = arith.mulf %34, %35 : vector<2x10xf32>
    %37 = math.roundeven %36 : vector<2x10xf32>
    %38 = vector.broadcast %2 : f32 to vector<2x10xf32>
    %39 = arith.addf %37, %38 : vector<2x10xf32>
    %cst_14 = arith.constant 0.000000e+00 : f32
    %cst_15 = arith.constant 2.550000e+02 : f32
    %40 = vector.broadcast %cst_14 : f32 to vector<2x10xf32>
    %41 = arith.maximumf %40, %39 : vector<2x10xf32>
    %42 = vector.broadcast %cst_15 : f32 to vector<2x10xf32>
    %43 = arith.minimumf %42, %41 : vector<2x10xf32>
    %44 = vector.broadcast %2 : f32 to vector<2x10xf32>
    %45 = arith.subf %43, %44 : vector<2x10xf32>
    %46 = vector.broadcast %0 : f32 to vector<2x10xf32>
    %47 = arith.mulf %45, %46 : vector<2x10xf32>
    %c0_16 = arith.constant 0 : index
    %c0_17 = arith.constant 0 : index
    %48 = vector.load %arg4[%c0_16, %c0_17] : memref<2x10xf32, #tpu.memory_space<vmem>>, vector<2x10xf32>
    tpu.vector_store %arg4[%c0_16, %c0_17], %47 {strides = array<i32>} : memref<2x10xf32, #tpu.memory_space<vmem>>, vector<2x10xf32>,
    return
  }
}

</mosaic_0001>

<bundles_post_ra>
// kernel: fake_quant_linear.1
= control target key start
LH: loop header
LB: loop body
LE: loop exit
PB: predicated region body
PF: predicated region fallthrough
CT: control target
= control target key end

     0   :  { %9 = vsyncpa [#allocation4], 0  ;;  %s288_s0 = inlined_call_operand.vmem [shape: f32[3], index: 0, kind: input, shape index: {}]   ;;  %s289_s1 = inlined_call_operand.vmem [shape: f32[2,5], index: 1, kind: input, shape index: {}]   ;;  %s290_s2 = inlined_call_operand.vmem [shape: f32[5,10], index: 2, kind: input, shape index: {}]   ;;  %s291_s3 = inlined_call_operand.vmem [shape: f32[3,10], index: 3, kind: input, shape index: {}]   ;;  %s292_s4 = inlined_call_operand.hbm [shape: f32[2,10], index: 4, kind: output, shape index: {}]  }
   0x1   :  { %10 = vsyncpa [#allocation3], 0  ;;  %s17_s17 = sshll.u32 %s288_s0, 4  ;;  %s18_s17 = int_to_ptr.vmem [resolvable:$true] %s17_s17 }
   0x2   :  { %s191_s18 = scalar_lea.vmem %s18_s17, 16  ;;  %p196_p1 = scmp.lt.s32.totalorder %s18_s17, %s18_s17 }
   0x3   :  { %p192_p0 = scmp.ne.s32.totalorder %s18_s17, %s191_s18  ;;  %p197_p2 = scmp.lt.s32.totalorder %s191_s18, %s191_s18 }
   0x5   :  { %p198_p3 = por %p197_p2, %p196_p1 }
   0x7   :  { %p199_p4 = pnand %p198_p3, %p192_p0 }
   0x9   :  { %202 = shalt.err (!%p199_p4)
}
   0xa   :  { %s229_s19 = smov [#allocation2]  }
   0xb   :  { %20 = dma.vmem_to_smem %s18_s17, 16, %s229_s19, [#allocation4]  }
   0xc   :  { %225 = dma.done.wait [#allocation4], 16  }
   0xd   :  { %226 = vsyncadd [#allocation4], 4294967280 }
   0xe   :  { %30 = sfence }
   0xf   :  { %v172_v0 = vld [vmem:[%s291_s3 + $0x1] ss:$0 sm:$0xff]  ;;  %v230_v1 = vmov 0.0   ;;  %vm231_vm0 = vmmov 0   ;;  %s170_s23 = sld [smem:[#allocation2 + $0x1]]  ;;  %s171_s26 = sld [smem:[#allocation2 + $0x2]] }
  0x10   :  { %179 = vmatprep.subr.mxu0 %v230_v1  ;;  %v48_v2 = vld [vmem:[%s290_s2] sm:$0x1f]  ;;  %181 = vmatprep.mubr.msk.f32.mxu0 %vm231_vm0, %v230_v1  ;;  %s31_s2 = sld [smem:[#allocation2]]  ;;  %vm72_vm1 = vcmask 1044480   ;;  %vm68_vm2 = vcmask 39936   ;;  %vm153_vm3 = vcmask 74752  }
  0x11   :  { %v53_v3 = vmul.f32 %v172_v0, %v48_v2  ;;  %v173_v4 = vld [vmem:[%s291_s3 + $0x2] ss:$0 sm:$0xff]  ;;  %v34_v7 = vld [vmem:[%s289_s1] sm:$0x3]  ;;  %s232_s1 = smov [#allocation5]  }
  0x12   :  { %v174_v13 = vld [vmem:[%s291_s3] ss:$0 sm:$0xff]  ;;  %s161_s3 = sshll.u32 %s232_s1, 4  ;;  %s162_s3 = int_to_ptr.vmem [resolvable:$true] %s161_s3 }
  0x13   :  { %v185_v5 = vround.rtne.f32 %v53_v3  ;;  %s203_s5 = scalar_lea.vmem %s162_s3, 32  ;;  %p208_p6 = scmp.lt.s32.totalorder %s162_s3, %s162_s3 }
  0x14   :  { %p204_p5 = scmp.ne.s32.totalorder %s162_s3, %s203_s5  ;;  %p209_p7 = scmp.lt.s32.totalorder %s203_s5, %s203_s5 }
  0x15   :  { %v59_v6 = vadd.f32 %v185_v5, %v173_v4  ;;  %v35_v9 = vstv %s170_s23  ;;  %v38_v12 = vstv %s171_s26 }
  0x16   :  { %v36_v10 = vmul.f32 %v35_v9, %v34_v7  ;;  %v43_v20 = vstv %s31_s2  ;;  %p210_p8 = por %p209_p7, %p208_p6 }
  0x17   :  { %v60_v8 = vmax.f32 %v59_v6, 0.0 }
  0x18   :  { %v184_v14 = vround.rtne.f32 %v36_v10  ;;  %p211_p9 = pnand %p210_p8, %p204_p5 }
  0x19   :  { %v61_v11 = vmin.f32 %v60_v8, 15.0 }
  0x1a   :  { %v39_v16 = vadd.f32 %v184_v14, %v38_v12 }
  0x1b   :  { %v62_v15 = vsub.f32 %v61_v11, %v173_v4 }
  0x1c   :  { %v40_v18 = vmax.f32 %v39_v16, 0.0 }
  0x1d   :  { %v67_v17 = vmul.f32 %v174_v13, %v62_v15 }
  0x1e   :  { %v41_v19 = vmin.f32 %v40_v18, 255.0 }
  0x1f   :  { %180 = vmatpush3.msk.msra.mxu0 %vm72_vm1, %v67_v17 }
  0x20   :  { %v42_v21 = vsub.f32 %v41_v19, %v38_v12 }
  0x22   :  { %v44_v22 = vmul.f32 %v43_v20, %v42_v21 }
  0x24   :  { %182 = vmatmul.mubr.msk.f32.vlgmr.msra.gmra.mrb[0].mxu0 %vm68_vm2, %v44_v22 }
  0xf7   :  { %v142_v23 = vpop.f32.mrb[0].mxu0 }
  0xf8   :  { %v146_v24 = vmul.f32 %v142_v23, %v35_v9  ;;  %v183_v25 = vpop.f32.mrb[1].mxu0 }
  0xfa   :  { %v186_v26 = vround.rtne.f32 %v146_v24 }
  0xfc   :  { %v148_v27 = vadd.f32 %v186_v26, %v38_v12 }
  0xfe   :  { %v149_v28 = vmax.f32 %v148_v27, 0.0 }
 0x100   :  { %v150_v29 = vmin.f32 %v149_v28, 255.0 }
 0x102   :  { %v151_v30 = vsub.f32 %v150_v29, %v38_v12 }
 0x104   :  { %v152_v31 = vmul.f32 %v151_v30, %v43_v20 }
 0x106   :  { %154 = vst.msk [vmem:[#allocation5] sm:$0x3] %vm153_vm3, %v152_v31 }
 0x107   :  { %214 = shalt.err (!%p211_p9)
}
 0x108   :  { %s215_s8 = scalar_lea.hbm %s292_s4, 32 }
 0x109   :  { %p216_p10 = scmp.ne.s32.totalorder %s292_s4, %s215_s8  ;;  %p219_p11 = scmp.lt.u32.totalorder %s215_s8, %s292_s4 }
 0x10b   :  { %p221_p12 = pnand %p219_p11, %p216_p10 }
 0x10d   :  { %224 = shalt.err (!%p221_p12)
}
 0x10e   :  { %164 = dma.vmem_to_hbm [thread:$0]  %s162_s3, 32, %s292_s4, [#allocation3]  }
 0x10f   :  { %227 = dma.done.wait [#allocation3], 32  }
 0x110   :  { %228 = vsyncadd [#allocation3], 4294967264 }
 0x111   :  { %168 = vsyncpa [#allocation3], 1 }
 0x112   :  { %169 = vsyncpa [#allocation4], 1 }

</bundles_post_ra>
